<compile_context>
chip_gen: v6e
topology: v6e:2x2x1
jax: 0.10.0
libtpu: 0.0.40
codegen_flags: <defaults>
</compile_context>

<pallas_src>
import functools

import jax
import jax.numpy as jnp
from jax.experimental import pallas as pl
from jax.experimental.pallas import tpu as pltpu


def _round_up(x, m):
    return ((x + m - 1) // m) * m


def _smooth_l1_mean_2d(x, y):
    # torch.nn.functional.smooth_l1_loss, beta=1.0, reduction='mean'; returns (1, 1).
    d = jnp.abs(x - y)
    v = jnp.where(d < 1.0, 0.5 * d * d, d - 0.5)
    s = jnp.sum(jnp.sum(v, axis=-1, keepdims=True), axis=0, keepdims=True)
    return s * (1.0 / v.size)


def _vdl_g_kernel(att_ref, marea_ref, bhot_ref, fv0_ref, fv1_ref,
                  tratio_ref, gfar_ref, sarea_ref, out_ref,
                  acc_ref, fv0acc_ref, fv1acc_ref,
                  *, gan_loss, tr_weight, far_weight, n_batch, n0, n1):
    pid = pl.program_id(0)
    last = pl.num_programs(0) - 1

    @pl.when(pid == 0)
    def _init():
        acc_ref[...] = jnp.zeros_like(acc_ref)
        fv0acc_ref[...] = jnp.zeros_like(fv0acc_ref)
        fv1acc_ref[...] = jnp.zeros_like(fv1acc_ref)

    # ---- streaming: per-batch program-class weight (pcw^T, shape (C, B)) ----
    # att_ref: (C, T), marea_ref: (1, T) = mask * area (fused in wrapper),
    # bhot_ref: (B, T).  B is tiny & static -> unrolled VPU mul + lane reductions.
    weighted = att_ref[...] * marea_ref[...]                       # (C, T)
    bhot = bhot_ref[...]                                           # (B, T)
    cols = []
    for b in range(n_batch):
        cols.append(jnp.sum(weighted * bhot[b:b + 1, :], axis=-1, keepdims=True))
    acc_ref[...] += jnp.concatenate(cols, axis=-1)                 # (C, B)

    # ---- streaming: adversarial partial sums (padding is loss-neutral) ----
    fv0 = fv0_ref[...]                                             # (1, chunk0)
    fv1 = fv1_ref[...]                                             # (1, chunk1)
    if gan_loss in ("WGANGP", "hinge"):
        t0, t1 = fv0, fv1
    elif gan_loss == "LSGAN":
        t0, t1 = (fv0 - 1.0) ** 2, (fv1 - 1.0) ** 2
    elif gan_loss == "NSGAN":
        eps = 1e-12
        t0 = -jnp.log(jnp.clip(fv0, eps, 1.0))
        t1 = -jnp.log(jnp.clip(fv1, eps, 1.0))
    else:
        raise ValueError(f"unknown gan_loss {gan_loss}")
    fv0acc_ref[...] += jnp.sum(t0, axis=-1, keepdims=True)         # (1, 1)
    fv1acc_ref[...] += jnp.sum(t1, axis=-1, keepdims=True)         # (1, 1)

    # ---- finalize ----
    @pl.when(pid == last)
    def _fin():
        acc = acc_ref[...]                                         # (C, B) = pcw^T
        row_sum = jnp.sum(acc, axis=0, keepdims=True)              # (1, B)
        norm_pcw = acc / jnp.maximum(row_sum, 1e-12)               # (C, B)
        far = row_sum / sarea_ref[...]                             # (1, B)

        m0 = fv0acc_ref[...] * (1.0 / n0)                          # true-count means
        m1 = fv1acc_ref[...] * (1.0 / n1)
        if gan_loss in ("WGANGP", "hinge"):
            adv = -m0 - m1
        else:  # LSGAN / NSGAN
            adv = m0 + m1

        zero = jnp.zeros((1, 1), jnp.float32)
        tr = zero if tr_weight == 0 else (
            jnp.float32(tr_weight) * _smooth_l1_mean_2d(norm_pcw, tratio_ref[...]))
        fl = zero if far_weight == 0 else (
            jnp.float32(far_weight) * _smooth_l1_mean_2d(far, gfar_ref[...]))
        total = adv + tr + fl

        out_ref[:, 0:1] = total
        out_ref[:, 1:2] = adv
        out_ref[:, 2:3] = tr
        out_ref[:, 3:4] = fl


def volumetric_design_loss_g(fv0, fv1, att, mask, voxel_feature, batch_onehot,
                             program_target_ratio, graph_far, site_area,
                             *, gan_loss="hinge", tr_weight=1.0, far_weight=1.0,
                             area_index=6, tile_nv=512):
    fv0 = jnp.asarray(fv0, jnp.float32)
    fv1 = jnp.asarray(fv1, jnp.float32)
    att = jnp.asarray(att, jnp.float32)
    mask = jnp.asarray(mask, jnp.float32)
    voxel_feature = jnp.asarray(voxel_feature, jnp.float32)
    batch_onehot = jnp.asarray(batch_onehot, jnp.float32)
    program_target_ratio = jnp.asarray(program_target_ratio, jnp.float32)
    graph_far = jnp.asarray(graph_far, jnp.float32)
    site_area = jnp.asarray(site_area, jnp.float32)

    n_vox, n_cls = att.shape
    n_batch = batch_onehot.shape[1]
    n0 = fv0.shape[0]
    n1 = fv1.shape[0]

    # ---- wrapper-side layout plumbing: fuse, transpose lane-dense, pad ----
    tile = min(tile_nv, _round_up(n_vox, 128))
    num_tiles = (n_vox + tile - 1) // tile
    nv_pad = num_tiles * tile

    marea = (mask[:, 0] * voxel_feature[:, area_index]).reshape(1, n_vox)  # fused mask*area
    att_t = att.T                                                          # (C, Nv)
    bhot_t = batch_onehot.T                                                # (B, Nv)
    if nv_pad != n_vox:
        pad = nv_pad - n_vox
        marea = jnp.pad(marea, ((0, 0), (0, pad)))
        att_t = jnp.pad(att_t, ((0, 0), (0, pad)))
        bhot_t = jnp.pad(bhot_t, ((0, 0), (0, pad)))

    # chunk fv0/fv1 across the same grid; pad with a loss-neutral value.
    pad_val = 0.0 if gan_loss in ("WGANGP", "hinge") else 1.0

    def prep_fv(fv):
        n = fv.shape[0]
        chunk = _round_up(-(-n // num_tiles), 128)
        fvp = jnp.pad(fv.reshape(1, n), ((0, 0), (0, num_tiles * chunk - n)),
                      constant_values=pad_val)
        return fvp, chunk

    fv0p, chunk0 = prep_fv(fv0)
    fv1p, chunk1 = prep_fv(fv1)

    tratio_t = program_target_ratio.T            # (C, B)
    gfar_t = graph_far.reshape(1, n_batch)       # (1, B)
    sarea_t = site_area.reshape(1, n_batch)      # (1, B)

    kernel = functools.partial(_vdl_g_kernel, gan_loss=gan_loss,
                               tr_weight=tr_weight, far_weight=far_weight,
                               n_batch=n_batch, n0=n0, n1=n1)

    stream = lambda i: (0, i)
    const = lambda i: (0, 0)
    grid_spec = pltpu.PrefetchScalarGridSpec(
        num_scalar_prefetch=0,
        grid=(num_tiles,),
        in_specs=[
            pl.BlockSpec((n_cls, tile), stream),     # att^T
            pl.BlockSpec((1, tile), stream),         # mask*area
            pl.BlockSpec((n_batch, tile), stream),   # onehot^T
            pl.BlockSpec((1, chunk0), stream),       # fv0
            pl.BlockSpec((1, chunk1), stream),       # fv1
            pl.BlockSpec((n_cls, n_batch), const),   # target ratio^T (resident)
            pl.BlockSpec((1, n_batch), const),       # target FAR
            pl.BlockSpec((1, n_batch), const),       # site area
        ],
        out_specs=pl.BlockSpec((1, 4), const),
        scratch_shapes=[
            pltpu.VMEM((n_cls, n_batch), jnp.float32),   # pcw^T accumulator
            pltpu.VMEM((1, 1), jnp.float32),             # fv0 partial sum
            pltpu.VMEM((1, 1), jnp.float32),             # fv1 partial sum
        ],
    )

    tile_bytes = 4 * (tile * (n_cls + 1 + n_batch) + chunk0 + chunk1)
    vmem_limit = int(min(32 * 1024 * 1024,
                         max(4 * 1024 * 1024, 4 * tile_bytes + (1 << 20))))
    in_bytes = sum(int(x.size) * 4 for x in
                   (att_t, marea, bhot_t, fv0p, fv1p, tratio_t, gfar_t, sarea_t))
    cost = pl.CostEstimate(
        flops=int(2 * nv_pad * n_cls * (n_batch + 1)
                  + 2 * (fv0p.size + fv1p.size)),
        transcendentals=int(fv0p.size + fv1p.size) if gan_loss == "NSGAN" else 0,
        bytes_accessed=in_bytes + 16)

    out = pl.pallas_call(
        kernel,
        out_shape=jax.ShapeDtypeStruct((1, 4), jnp.float32),
        grid_spec=grid_spec,
        compiler_params=pltpu.CompilerParams(
            dimension_semantics=("arbitrary",),        # Nv axis is a reduction
            vmem_limit_bytes=vmem_limit),
        cost_estimate=cost,
    )(att_t, marea, bhot_t, fv0p, fv1p, tratio_t, gfar_t, sarea_t)

    # (total_loss, adversarial_loss, target_ratio_loss, far_loss)
    return out[0, 0], out[0, 1], out[0, 2], out[0, 3]


# ---------------------------- pure-JAX reference ----------------------------
def _ref_smooth_l1(x, y):
    d = jnp.abs(x - y)
    return jnp.mean(jnp.where(d < 1.0, 0.5 * d * d, d - 0.5))


def _reference(fv0, fv1, att, mask, voxel_feature, batch_onehot,
               program_target_ratio, graph_far, site_area,
               gan_loss, tr_weight, far_weight, area_index):
    if gan_loss in ("WGANGP", "hinge"):
        adv = -jnp.mean(fv0) - jnp.mean(fv1)
    elif gan_loss == "LSGAN":
        adv = jnp.mean((fv0 - 1.0) ** 2) + jnp.mean((fv1 - 1.0) ** 2)
    else:
        adv = (-jnp.mean(jnp.log(jnp.clip(fv0, 1e-12, 1.0)))
               - jnp.mean(jnp.log(jnp.clip(fv1, 1e-12, 1.0))))
    area = voxel_feature[:, area_index:area_index + 1]
    weighted = att * mask * area
    pcw = batch_onehot.T @ weighted
    row_sum = jnp.sum(pcw, axis=-1, keepdims=True)
    norm_pcw = pcw / jnp.maximum(row_sum, 1e-12)
    far = row_sum / site_area
    tr = tr_weight * _ref_smooth_l1(norm_pcw, program_target_ratio)
    fl = far_weight * _ref_smooth_l1(far, graph_far)
    return adv + tr + fl, adv, tr, fl


if __name__ == "__main__":
    key = jax.random.PRNGKey(0)
    k = jax.random.split(key, 8)

    N0, N1 = 16, 8          # fake_validity_voxel[0], [1]
    Nv, C, B, F = 64, 4, 2, 8
    area_index = 6

    fv_raw0 = jax.random.normal(k[0], (N0, 1), jnp.float32)
    fv_raw1 = jax.random.normal(k[1], (N1, 1), jnp.float32)
    att = jax.nn.softmax(jax.random.normal(k[2], (Nv, C), jnp.float32), axis=-1)
    mask = (jax.random.uniform(k[3], (Nv, 1)) > 0.3).astype(jnp.float32)
    voxel_feature = jax.random.uniform(k[4], (Nv, F), jnp.float32, 0.5, 2.0)
    batch_ids = jnp.concatenate([jnp.zeros(Nv // 2, jnp.int32),
                                 jnp.ones(Nv - Nv // 2, jnp.int32)])
    batch_onehot = jax.nn.one_hot(batch_ids, B, dtype=jnp.float32)       # (Nv, B)
    tgt = jax.random.uniform(k[5], (B, C), jnp.float32, 0.1, 1.0)
    program_target_ratio = tgt / jnp.sum(tgt, axis=-1, keepdims=True)    # (B, C)
    graph_far = jax.random.uniform(k[6], (B, 1), jnp.float32, 0.5, 2.0)
    site_area = jax.random.uniform(k[7], (B, 1), jnp.float32, 20.0, 40.0)

    cases = [
        ("hinge", fv_raw0, fv_raw1),
        ("LSGAN", fv_raw0, fv_raw1),
        ("NSGAN", jax.nn.sigmoid(fv_raw0), jax.nn.sigmoid(fv_raw1)),  # probabilities
    ]
    for gan_loss, fv0, fv1 in cases:
        outs = volumetric_design_loss_g(
            fv0, fv1, att, mask, voxel_feature, batch_onehot,
            program_target_ratio, graph_far, site_area,
            gan_loss=gan_loss, tr_weight=1.0, far_weight=1.0,
            area_index=area_index)
        outs = jax.block_until_ready(outs)

        refs = _reference(fv0, fv1, att, mask, voxel_feature, batch_onehot,
                          program_target_ratio, graph_far, site_area,
                          gan_loss, 1.0, 1.0, area_index)
        for got, want in zip(outs, refs):
            assert jnp.allclose(got, want, rtol=1e-5, atol=1e-5), (gan_loss, got, want)

    print("KERNEL_OK")
</pallas_src>

<mosaic_0001>
module attributes {stable_mosaic.version = 11 : i64} {
  func.func @_vdl_g_kernel(%arg0: i32, %arg1: memref<4x128xf32, #tpu.memory_space<vmem>>, %arg2: memref<1x128xf32, #tpu.memory_space<vmem>>, %arg3: memref<2x128xf32, #tpu.memory_space<vmem>>, %arg4: memref<1x128xf32, #tpu.memory_space<vmem>>, %arg5: memref<1x128xf32, #tpu.memory_space<vmem>>, %arg6: memref<4x2xf32, #tpu.memory_space<vmem>>, %arg7: memref<1x2xf32, #tpu.memory_space<vmem>>, %arg8: memref<1x2xf32, #tpu.memory_space<vmem>>, %arg9: memref<1x4xf32, #tpu.memory_space<vmem>>, %arg10: memref<4x2xf32, #tpu.memory_space<vmem>>, %arg11: memref<1x1xf32, #tpu.memory_space<vmem>>, %arg12: memref<1x1xf32, #tpu.memory_space<vmem>>) attributes {dimension_semantics = [#tpu.dimension_semantics<arbitrary>], iteration_bounds = array<i64: 1>, scalar_prefetch = 0 : i64, scratch_operands = 3 : i64, tpu.core_type = #tpu.core_type<tc>, window_params = [{transform_indices = @transform_0, window_bounds = array<i64: 4, 128>}, {transform_indices = @transform_1, window_bounds = array<i64: 1, 128>}, {transform_indices = @transform_2, window_bounds = array<i64: 2, 128>}, {transform_indices = @transform_3, window_bounds = array<i64: 1, 128>}, {transform_indices = @transform_4, window_bounds = array<i64: 1, 128>}, {pipeline_mode = #tpu.pipeline_mode<synchronous>, transform_indices = @transform_5, window_bounds = array<i64: 4, 2>}, {pipeline_mode = #tpu.pipeline_mode<synchronous>, transform_indices = @transform_6, window_bounds = array<i64: 1, 2>}, {pipeline_mode = #tpu.pipeline_mode<synchronous>, transform_indices = @transform_7, window_bounds = array<i64: 1, 2>}, {pipeline_mode = #tpu.pipeline_mode<synchronous>, transform_indices = @transform_8, window_bounds = array<i64: 1, 4>}]} {
    %c0_i32 = arith.constant 0 : i32
    %0 = arith.cmpi eq, %arg0, %c0_i32 : i32
    %1 = arith.extui %0 : i1 to i32
    %c0_i32_0 = arith.constant 0 : i32
    %2 = arith.cmpi ne, %1, %c0_i32_0 : i32
    scf.if %2 {
      %cst_27 = arith.constant 0.000000e+00 : f32
      %37 = vector.broadcast %cst_27 : f32 to vector<4x2xf32>
      %c0_28 = arith.constant 0 : index
      %c0_29 = arith.constant 0 : index
      %38 = vector.load %arg10[%c0_28, %c0_29] : memref<4x2xf32, #tpu.memory_space<vmem>>, vector<4x2xf32>
      tpu.vector_store %arg10[%c0_28, %c0_29], %37 {strides = array<i32>} : memref<4x2xf32, #tpu.memory_space<vmem>>, vector<4x2xf32>,
      %cst_30 = arith.constant 0.000000e+00 : f32
      %39 = vector.broadcast %cst_30 : f32 to vector<1x1xf32>
      %c0_31 = arith.constant 0 : index
      %c0_32 = arith.constant 0 : index
      %40 = vector.load %arg11[%c0_31, %c0_32] : memref<1x1xf32, #tpu.memory_space<vmem>>, vector<1x1xf32>
      tpu.vector_store %arg11[%c0_31, %c0_32], %39 {strides = array<i32>} : memref<1x1xf32, #tpu.memory_space<vmem>>, vector<1x1xf32>,
      %cst_33 = arith.constant 0.000000e+00 : f32
      %41 = vector.broadcast %cst_33 : f32 to vector<1x1xf32>
      %c0_34 = arith.constant 0 : index
      %c0_35 = arith.constant 0 : index
      %42 = vector.load %arg12[%c0_34, %c0_35] : memref<1x1xf32, #tpu.memory_space<vmem>>, vector<1x1xf32>
      tpu.vector_store %arg12[%c0_34, %c0_35], %41 {strides = array<i32>} : memref<1x1xf32, #tpu.memory_space<vmem>>, vector<1x1xf32>,
    } else {
    }
    %c0 = arith.constant 0 : index
    %c0_1 = arith.constant 0 : index
    %3 = vector.load %arg1[%c0, %c0_1] : memref<4x128xf32, #tpu.memory_space<vmem>>, vector<4x128xf32>
    %c0_2 = arith.constant 0 : index
    %c0_3 = arith.constant 0 : index
    %4 = vector.load %arg2[%c0_2, %c0_3] : memref<1x128xf32, #tpu.memory_space<vmem>>, vector<1x128xf32>
    %5 = vector.broadcast %4 : vector<1x128xf32> to vector<4x128xf32>
    %6 = arith.mulf %3, %5 : vector<4x128xf32>
    %c0_4 = arith.constant 0 : index
    %c0_5 = arith.constant 0 : index
    %7 = vector.load %arg3[%c0_4, %c0_5] : memref<2x128xf32, #tpu.memory_space<vmem>>, vector<2x128xf32>
    %8 = vector.extract_strided_slice %7 {offsets = [0, 0], sizes = [1, 128], strides = [1, 1]} : vector<2x128xf32> to vector<1x128xf32>
    %9 = vector.broadcast %8 : vector<1x128xf32> to vector<4x128xf32>
    %10 = arith.mulf %6, %9 : vector<4x128xf32>
    %cst = arith.constant dense<0.000000e+00> : vector<4xf32>
    %11 = vector.multi_reduction <add>, %10, %cst [1] : vector<4x128xf32> to vector<4xf32>
    %12 = vector.shape_cast %11 : vector<4xf32> to vector<4x1xf32>
    %13 = vector.extract_strided_slice %7 {offsets = [1, 0], sizes = [1, 128], strides = [1, 1]} : vector<2x128xf32> to vector<1x128xf32>
    %14 = vector.broadcast %13 : vector<1x128xf32> to vector<4x128xf32>
    %15 = arith.mulf %6, %14 : vector<4x128xf32>
    %cst_6 = arith.constant dense<0.000000e+00> : vector<4xf32>
    %16 = vector.multi_reduction <add>, %15, %cst_6 [1] : vector<4x128xf32> to vector<4xf32>
    %17 = vector.shape_cast %16 : vector<4xf32> to vector<4x1xf32>
    %c0_7 = arith.constant 0 : index
    %c0_8 = arith.constant 0 : index
    %18 = vector.load %arg10[%c0_7, %c0_8] : memref<4x2xf32, #tpu.memory_space<vmem>>, vector<4x2xf32>
    %19 = tpu.concatenate %12, %17 in 1 : vector<4x1xf32>, vector<4x1xf32> -> vector<4x2xf32>
    %20 = arith.addf %18, %19 : vector<4x2xf32>
    %c0_9 = arith.constant 0 : index
    %c0_10 = arith.constant 0 : index
    %21 = vector.load %arg10[%c0_9, %c0_10] : memref<4x2xf32, #tpu.memory_space<vmem>>, vector<4x2xf32>
    tpu.vector_store %arg10[%c0_9, %c0_10], %20 {strides = array<i32>} : memref<4x2xf32, #tpu.memory_space<vmem>>, vector<4x2xf32>,
    %c0_11 = arith.constant 0 : index
    %c0_12 = arith.constant 0 : index
    %22 = vector.load %arg4[%c0_11, %c0_12] : memref<1x128xf32, #tpu.memory_space<vmem>>, vector<1x128xf32>
    %c0_13 = arith.constant 0 : index
    %c0_14 = arith.constant 0 : index
    %23 = vector.load %arg5[%c0_13, %c0_14] : memref<1x128xf32, #tpu.memory_space<vmem>>, vector<1x128xf32>
    %c0_15 = arith.constant 0 : index
    %c0_16 = arith.constant 0 : index
    %24 = vector.load %arg11[%c0_15, %c0_16] : memref<1x1xf32, #tpu.memory_space<vmem>>, vector<1x1xf32>
    %cst_17 = arith.constant dense<0.000000e+00> : vector<1xf32>
    %25 = vector.multi_reduction <add>, %22, %cst_17 [1] : vector<1x128xf32> to vector<1xf32>
    %26 = vector.shape_cast %25 : vector<1xf32> to vector<1x1xf32>
    %27 = arith.addf %24, %26 : vector<1x1xf32>
    %c0_18 = arith.constant 0 : index
    %c0_19 = arith.constant 0 : index
    %28 = vector.load %arg11[%c0_18, %c0_19] : memref<1x1xf32, #tpu.memory_space<vmem>>, vector<1x1xf32>
    tpu.vector_store %arg11[%c0_18, %c0_19], %27 {strides = array<i32>} : memref<1x1xf32, #tpu.memory_space<vmem>>, vector<1x1xf32>,
    %c0_20 = arith.constant 0 : index
    %c0_21 = arith.constant 0 : index
    %29 = vector.load %arg12[%c0_20, %c0_21] : memref<1x1xf32, #tpu.memory_space<vmem>>, vector<1x1xf32>
    %cst_22 = arith.constant dense<0.000000e+00> : vector<1xf32>
    %30 = vector.multi_reduction <add>, %23, %cst_22 [1] : vector<1x128xf32> to vector<1xf32>
    %31 = vector.shape_cast %30 : vector<1xf32> to vector<1x1xf32>
    %32 = arith.addf %29, %31 : vector<1x1xf32>
    %c0_23 = arith.constant 0 : index
    %c0_24 = arith.constant 0 : index
    %33 = vector.load %arg12[%c0_23, %c0_24] : memref<1x1xf32, #tpu.memory_space<vmem>>, vector<1x1xf32>
    tpu.vector_store %arg12[%c0_23, %c0_24], %32 {strides = array<i32>} : memref<1x1xf32, #tpu.memory_space<vmem>>, vector<1x1xf32>,
    %c0_i32_25 = arith.constant 0 : i32
    %34 = arith.cmpi eq, %arg0, %c0_i32_25 : i32
    %35 = arith.extui %34 : i1 to i32
    %c0_i32_26 = arith.constant 0 : i32
    %36 = arith.cmpi ne, %35, %c0_i32_26 : i32
    scf.if %36 {
      %c0_27 = arith.constant 0 : index
      %c0_28 = arith.constant 0 : index
      %37 = vector.load %arg10[%c0_27, %c0_28] : memref<4x2xf32, #tpu.memory_space<vmem>>, vector<4x2xf32>
      %cst_29 = arith.constant dense<0.000000e+00> : vector<2xf32>
      %38 = vector.multi_reduction <add>, %37, %cst_29 [0] : vector<4x2xf32> to vector<2xf32>
      %39 = vector.shape_cast %38 : vector<2xf32> to vector<1x2xf32>
      %cst_30 = arith.constant 9.99999996E-13 : f32
      %40 = vector.broadcast %cst_30 : f32 to vector<1x2xf32>
      %41 = arith.maximumf %39, %40 : vector<1x2xf32>
      %42 = vector.broadcast %41 : vector<1x2xf32> to vector<4x2xf32>
      %43 = arith.divf %37, %42 : vector<4x2xf32>
      %c0_31 = arith.constant 0 : index
      %c0_32 = arith.constant 0 : index
      %44 = vector.load %arg8[%c0_31, %c0_32] : memref<1x2xf32, #tpu.memory_space<vmem>>, vector<1x2xf32>
      %45 = arith.divf %39, %44 : vector<1x2xf32>
      %c0_33 = arith.constant 0 : index
      %c0_34 = arith.constant 0 : index
      %46 = vector.load %arg11[%c0_33, %c0_34] : memref<1x1xf32, #tpu.memory_space<vmem>>, vector<1x1xf32>
      %cst_35 = arith.constant 6.250000e-02 : f32
      %47 = vector.broadcast %cst_35 : f32 to vector<1x1xf32>
      %48 = arith.mulf %46, %47 : vector<1x1xf32>
      %c0_36 = arith.constant 0 : index
      %c0_37 = arith.constant 0 : index
      %49 = vector.load %arg12[%c0_36, %c0_37] : memref<1x1xf32, #tpu.memory_space<vmem>>, vector<1x1xf32>
      %cst_38 = arith.constant 1.250000e-01 : f32
      %50 = vector.broadcast %cst_38 : f32 to vector<1x1xf32>
      %51 = arith.mulf %49, %50 : vector<1x1xf32>
      %cst_39 = arith.constant 0.000000e+00 : f32
      %52 = vector.broadcast %cst_39 : f32 to vector<1x1xf32>
      %53 = arith.subf %52, %48 : vector<1x1xf32>
      %54 = arith.subf %53, %51 : vector<1x1xf32>
      %c0_40 = arith.constant 0 : index
      %c0_41 = arith.constant 0 : index
      %55 = vector.load %arg6[%c0_40, %c0_41] : memref<4x2xf32, #tpu.memory_space<vmem>>, vector<4x2xf32>
      %56 = arith.subf %43, %55 : vector<4x2xf32>
      %57 = math.absf %56 : vector<4x2xf32>
      %cst_42 = arith.constant 1.000000e+00 : f32
      %58 = vector.broadcast %cst_42 : f32 to vector<4x2xf32>
      %59 = arith.cmpf olt, %57, %58 : vector<4x2xf32>
      %cst_43 = arith.constant 5.000000e-01 : f32
      %60 = vector.broadcast %cst_43 : f32 to vector<4x2xf32>
      %61 = arith.mulf %60, %57 : vector<4x2xf32>
      %62 = arith.mulf %61, %57 : vector<4x2xf32>
      %cst_44 = arith.constant 5.000000e-01 : f32
      %63 = vector.broadcast %cst_44 : f32 to vector<4x2xf32>
      %64 = arith.subf %57, %63 : vector<4x2xf32>
      %65 = arith.select %59, %62, %64 : vector<4x2xi1>, vector<4x2xf32>
      %cst_45 = arith.constant dense<0.000000e+00> : vector<4xf32>
      %66 = vector.multi_reduction <add>, %65, %cst_45 [1] : vector<4x2xf32> to vector<4xf32>
      %67 = vector.shape_cast %66 : vector<4xf32> to vector<4x1xf32>
      %cst_46 = arith.constant dense<0.000000e+00> : vector<1xf32>
      %68 = vector.multi_reduction <add>, %67, %cst_46 [0] : vector<4x1xf32> to vector<1xf32>
      %69 = vector.shape_cast %68 : vector<1xf32> to vector<1x1xf32>
      %cst_47 = arith.constant 1.250000e-01 : f32
      %70 = vector.broadcast %cst_47 : f32 to vector<1x1xf32>
      %71 = arith.mulf %69, %70 : vector<1x1xf32>
      %cst_48 = arith.constant 1.000000e+00 : f32
      %72 = vector.broadcast %cst_48 : f32 to vector<1x1xf32>
      %73 = arith.mulf %72, %71 : vector<1x1xf32>
      %c0_49 = arith.constant 0 : index
      %c0_50 = arith.constant 0 : index
      %74 = vector.load %arg7[%c0_49, %c0_50] : memref<1x2xf32, #tpu.memory_space<vmem>>, vector<1x2xf32>
      %75 = arith.subf %45, %74 : vector<1x2xf32>
      %76 = math.absf %75 : vector<1x2xf32>
      %cst_51 = arith.constant 1.000000e+00 : f32
      %77 = vector.broadcast %cst_51 : f32 to vector<1x2xf32>
      %78 = arith.cmpf olt, %76, %77 : vector<1x2xf32>
      %cst_52 = arith.constant 5.000000e-01 : f32
      %79 = vector.broadcast %cst_52 : f32 to vector<1x2xf32>
      %80 = arith.mulf %79, %76 : vector<1x2xf32>
      %81 = arith.mulf %80, %76 : vector<1x2xf32>
      %cst_53 = arith.constant 5.000000e-01 : f32
      %82 = vector.broadcast %cst_53 : f32 to vector<1x2xf32>
      %83 = arith.subf %76, %82 : vector<1x2xf32>
      %84 = arith.select %78, %81, %83 : vector<1x2xi1>, vector<1x2xf32>
      %cst_54 = arith.constant dense<0.000000e+00> : vector<1xf32>
      %85 = vector.multi_reduction <add>, %84, %cst_54 [1] : vector<1x2xf32> to vector<1xf32>
      %86 = vector.shape_cast %85 : vector<1xf32> to vector<1x1xf32>
      %cst_55 = arith.constant dense<0.000000e+00> : vector<1xf32>
      %87 = vector.multi_reduction <add>, %86, %cst_55 [0] : vector<1x1xf32> to vector<1xf32>
      %88 = vector.shape_cast %87 : vector<1xf32> to vector<1x1xf32>
      %cst_56 = arith.constant 5.000000e-01 : f32
      %89 = vector.broadcast %cst_56 : f32 to vector<1x1xf32>
      %90 = arith.mulf %88, %89 : vector<1x1xf32>
      %cst_57 = arith.constant 1.000000e+00 : f32
      %91 = vector.broadcast %cst_57 : f32 to vector<1x1xf32>
      %92 = arith.mulf %91, %90 : vector<1x1xf32>
      %93 = arith.addf %54, %73 : vector<1x1xf32>
      %94 = arith.addf %93, %92 : vector<1x1xf32>
      %c0_58 = arith.constant 0 : index
      %c0_59 = arith.constant 0 : index
      %95 = vector.load %arg9[%c0_58, %c0_59] : memref<1x4xf32, #tpu.memory_space<vmem>>, vector<1x1xf32>
      tpu.vector_store %arg9[%c0_58, %c0_59], %94 {strides = array<i32>} : memref<1x4xf32, #tpu.memory_space<vmem>>, vector<1x1xf32>,
      %c0_60 = arith.constant 0 : index
      %c1 = arith.constant 1 : index
      %96 = vector.load %arg9[%c0_60, %c1] : memref<1x4xf32, #tpu.memory_space<vmem>>, vector<1x1xf32>
      tpu.vector_store %arg9[%c0_60, %c1], %54 {strides = array<i32>} : memref<1x4xf32, #tpu.memory_space<vmem>>, vector<1x1xf32>,
      %c0_61 = arith.constant 0 : index
      %c2 = arith.constant 2 : index
      %97 = vector.load %arg9[%c0_61, %c2] : memref<1x4xf32, #tpu.memory_space<vmem>>, vector<1x1xf32>
      tpu.vector_store %arg9[%c0_61, %c2], %73 {strides = array<i32>} : memref<1x4xf32, #tpu.memory_space<vmem>>, vector<1x1xf32>,
      %c0_62 = arith.constant 0 : index
      %c3 = arith.constant 3 : index
      %98 = vector.load %arg9[%c0_62, %c3] : memref<1x4xf32, #tpu.memory_space<vmem>>, vector<1x1xf32>
      tpu.vector_store %arg9[%c0_62, %c3], %92 {strides = array<i32>} : memref<1x4xf32, #tpu.memory_space<vmem>>, vector<1x1xf32>,
    } else {
    }
    return
  }
  func.func @transform_0(%arg0: i32) -> (i32, i32) {
    %c0_i32 = arith.constant 0 : i32
    %c0_i32_0 = arith.constant 0 : i32
    return %c0_i32, %arg0 : i32, i32
  }
  func.func @transform_1(%arg0: i32) -> (i32, i32) {
    %c0_i32 = arith.constant 0 : i32
    %c0_i32_0 = arith.constant 0 : i32
    return %c0_i32, %arg0 : i32, i32
  }
  func.func @transform_2(%arg0: i32) -> (i32, i32) {
    %c0_i32 = arith.constant 0 : i32
    %c0_i32_0 = arith.constant 0 : i32
    return %c0_i32, %arg0 : i32, i32
  }
  func.func @transform_3(%arg0: i32) -> (i32, i32) {
    %c0_i32 = arith.constant 0 : i32
    %c0_i32_0 = arith.constant 0 : i32
    return %c0_i32, %arg0 : i32, i32
  }
  func.func @transform_4(%arg0: i32) -> (i32, i32) {
    %c0_i32 = arith.constant 0 : i32
    %c0_i32_0 = arith.constant 0 : i32
    return %c0_i32, %arg0 : i32, i32
  }
  func.func @transform_5(%arg0: i32) -> (i32, i32) {
    %c0_i32 = arith.constant 0 : i32
    %c0_i32_0 = arith.constant 0 : i32
    %c0_i32_1 = arith.constant 0 : i32
    return %c0_i32, %c0_i32_0 : i32, i32
  }
  func.func @transform_6(%arg0: i32) -> (i32, i32) {
    %c0_i32 = arith.constant 0 : i32
    %c0_i32_0 = arith.constant 0 : i32
    %c0_i32_1 = arith.constant 0 : i32
    return %c0_i32, %c0_i32_0 : i32, i32
  }
  func.func @transform_7(%arg0: i32) -> (i32, i32) {
    %c0_i32 = arith.constant 0 : i32
    %c0_i32_0 = arith.constant 0 : i32
    %c0_i32_1 = arith.constant 0 : i32
    return %c0_i32, %c0_i32_0 : i32, i32
  }
  func.func @transform_8(%arg0: i32) -> (i32, i32) {
    %c0_i32 = arith.constant 0 : i32
    %c0_i32_0 = arith.constant 0 : i32
    %c0_i32_1 = arith.constant 0 : i32
    return %c0_i32, %c0_i32_0 : i32, i32
  }
}

</mosaic_0001>

<bundles_post_ra>
// kernel: tpu_custom_call.1
= control target key start
LH: loop header
LB: loop body
LE: loop exit
PB: predicated region body
PF: predicated region fallthrough
CT: control target
= control target key end

     0   :  { %v49_v2 = vlaneseq  ;;  %vm75_vm0 = vcmask 1040384   ;;  %s302_s0 = inlined_call_operand.vmem [shape: f32[4,128], index: 0, kind: input, shape index: {}]   ;;  %s303_s1 = inlined_call_operand.vmem [shape: f32[1,128], index: 1, kind: input, shape index: {}]   ;;  %s304_s2 = inlined_call_operand.vmem [shape: f32[2,128], index: 2, kind: input, shape index: {}]   ;;  %s305_s3 = inlined_call_operand.vmem [shape: f32[1,128], index: 3, kind: input, shape index: {}]   ;;  %s306_s4 = inlined_call_operand.vmem [shape: f32[1,128], index: 4, kind: input, shape index: {}]   ;;  %s307_s5 = inlined_call_operand.vmem [shape: f32[4,2], index: 5, kind: input, shape index: {}]   ;;  %s308_s6 = inlined_call_operand.vmem [shape: f32[1,2], index: 6, kind: input, shape index: {}]   ;;  %s309_s7 = inlined_call_operand.vmem [shape: f32[1,2], index: 7, kind: input, shape index: {}]   ;;  %s310_s8 = inlined_call_operand.hbm [shape: f32[1,4], index: 8, kind: output, shape index: {}]  }
   0x1   :  { %v39_v0 = vld [vmem:[%s302_s0] sm:$0xf] }
   0x2   :  { %v175_v1 = vld [vmem:[%s303_s1] ss:$0 sm:$0xff]  ;;  %v267_v5 = vshrl.u32 %v49_v2, 7 }
   0x3   :  { %v72_v3 = vld [vmem:[%s305_s3] sm:$0x1] }
   0x4   :  { %v73_v4 = vld [vmem:[%s306_s4] sm:$0x1]  ;;  %v76_v6 = vsel %vm75_vm0, %v72_v3, 0.0 }
   0x5   :  { %13 = vsyncpa [#allocation6], 0  ;;  %v48_v7 = vld [vmem:[%s304_s2] sm:$0x3]  ;;  %77 = vadd.xlane.f32.xlu1 %v76_v6  ;;  %v47_v8 = vmul.f32 %v175_v1, %v39_v0  ;;  %v51_v9 = vsub.s32 0, %v267_v5  ;;  %v60_v10 = vsub.s32 1, %v267_v5 }
   0x6   :  { %v83_v11 = vsel %vm75_vm0, %v73_v4, 0.0  ;;  %vm54_vm1 = vcmask 1043456   ;;  %vm34_vm2 = vcmask 11264   ;;  %v207_v18 = vmov 0.0   ;;  %v102_v30 = vld [vmem:[%s309_s7] sm:$0x1] }
   0x7   :  { %v52_v12 = vrot.slane %v48_v7, %v51_v9  ;;  %v61_v13 = vrot.slane %v48_v7, %v60_v10  ;;  %35 = vst.msk [vmem:[#allocation2] sm:$0xf] %vm34_vm2, %v207_v18  ;;  %vm36_vm3 = vcmask 0   ;;  %vm67_vm4 = vcmask 7168   ;;  %v130_v40 = vld [vmem:[%s308_s6] sm:$0x1] }
   0x8   :  { %37 = vst.msk [vmem:[#allocation3] sm:$0x1] %vm36_vm3, %v207_v18  ;;  %38 = vst.msk [vmem:[#allocation4] sm:$0x1] %vm36_vm3, %v207_v18  ;;  %181 = vrcp.f32 %v102_v30  ;;  %vm138_vm5 = vcmask 8192   ;;  %vm155_vm8 = vcmask 8200  }
   0x9   :  { %84 = vadd.xlane.f32.xlu1 %v83_v11  ;;  %v53_v14 = vmul.f32 %v52_v12, %v47_v8  ;;  %v62_v15 = vmul.f32 %v61_v13, %v47_v8  ;;  %v111_v51 = vld [vmem:[%s307_s5] sm:$0xf]  ;;  %s208_s5 = smov 1   ;;  %s209_s6 = smov [#allocation5]   ;;  %vm157_vm9 = vcmask 16400   ;;  %vm159_vm10 = vcmask 24600  }
   0xa   :  { %s167_s15 = sshll.u32 %s209_s6, 4  ;;  %s168_s15 = int_to_ptr.vmem [resolvable:$true] %s167_s15 }
   0xb   :  { %v55_v16 = vsel %vm54_vm1, %v53_v14, 0.0  ;;  %v63_v17 = vsel %vm54_vm1, %v62_v15, 0.0  ;;  %s185_s16 = scalar_lea.vmem %s168_s15, 16  ;;  %s189_s17 = scalar_lea.vmem %s168_s15, 32 }
   0xc   :  { %56 = vadd.xlane.f32.xlu0 %v55_v16  ;;  %p186_p0 = scmp.ne.s32.totalorder %s168_s15, %s185_s16  ;;  %p190_p1 = scmp.lt.s32.totalorder %s168_s15, %s168_s15 }
   0xd   :  { %p191_p2 = scmp.lt.s32.totalorder %s189_s17, %s185_s16 }
   0xe   :  { %v66_v26 = vld [vmem:[#allocation2] sm:$0xf] }
   0xf   :  { %v74_v19 = vld [vmem:[#allocation3] sm:$0x1]  ;;  %v82_v22 = vld [vmem:[#allocation4] sm:$0x1]  ;;  %p192_p3 = por %p191_p2, %p190_p1 }
  0x10   :  { %64 = vadd.xlane.f32.xlu0 %v63_v17 }
  0x11   :  { %p193_p4 = pnand %p192_p3, %p186_p0 }
  0x15   :  { %v182_v38 = vpop.eup %181 }
  0x8e   :  { %v78_v20 = vpop.xlane.xlu1 %77 }
  0x8f   :  { %v79_v21 = vadd.f32 %v78_v20, %v74_v19 }
  0x91   :  { %81 = vst.msk [vmem:[#allocation3] sm:$0x1] %vm36_vm3, %v79_v21 }
  0x92   :  { %v85_v23 = vpop.xlane.xlu1 %84 }
  0x93   :  { %v86_v24 = vadd.f32 %v85_v23, %v82_v22 }
  0x95   :  { %87 = vst.msk [vmem:[#allocation4] sm:$0x1] %vm36_vm3, %v86_v24  ;;  %v57_v25 = vpop.xlane.xlu0 %56 }
  0x98   :  { %v105_v60 = vld [vmem:[#allocation3] sm:$0x1] }
  0x99   :  { %v65_v27 = vpop.xlane.xlu0 %64  ;;  %v106_v61 = vmul.f32 0.0625, %v105_v60 }
  0x9a   :  { %v68_v28 = vsel %vm67_vm4, %v57_v25, %v65_v27 }
  0x9b   :  { %v69_v29 = vadd.f32 %v68_v28, %v66_v26  ;;  %v109_v0 = vsub.f32 0.0, %v106_v61 }
  0x9c   :  { %v107_v62 = vld [vmem:[#allocation4] sm:$0x1] }
  0x9d   :  { %71 = vst.msk [vmem:[#allocation2] sm:$0xf] %vm34_vm2, %v69_v29  ;;  %v108_v63 = vmul.f32 0.125, %v107_v62 }
  0x9f   :  { %v110_v1 = vsub.f32 %v109_v0, %v108_v63 }
  0xa1   :  { %v151_v2 = vrot.slane %v110_v1, %v51_v9 }
  0xa4   :  { %v91_v31 = vld [vmem:[#allocation2] sm:$0xf] }
  0xa5   :  { %v92_v32 = vsel %vm34_vm2, %v91_v31, 0.0 }
  0xa6   :  { %v93_v33 = vrot.slane %v92_v32, 4 }
  0xa8   :  { %v94_v34 = vadd.f32 %v93_v33, %v92_v32 }
  0xaa   :  { %v95_v35 = vrot.slane %v94_v34, 2 }
  0xac   :  { %v96_v36 = vadd.f32 %v95_v35, %v94_v34 }
  0xae   :  { %v97_v37 = vrot.slane %v96_v36, 1 }
  0xb0   :  { %v98_v39 = vadd.f32 %v97_v37, %v96_v36 }
  0xb2   :  { %v104_v41 = vmul.f32 %v182_v38, %v98_v39  ;;  %v99_v42 = vmax.f32 %v98_v39, 1e-12 }
  0xb4   :  { %v131_v43 = vsub.f32 %v104_v41, %v130_v40  ;;  %183 = vrcp.f32 %v99_v42 }
  0xb6   :  { %v132_v44 = vand.u32 2147483647, %v131_v43 }
  0xb8   :  { %v134_v45 = vmul.f32 0.5, %v132_v44  ;;  %v177_v47 = vadd.f32 -0.5, %v132_v44  ;;  %vm133_vm6 = vcmp.lt.f32.partialorder %v132_v44, 1.0 }
  0xba   :  { %v135_v46 = vmul.f32 %v134_v45, %v132_v44 }
  0xbc   :  { %v137_v48 = vsel %vm133_vm6, %v135_v46, %v177_v47 }
  0xbd   :  { %v139_v49 = vsel %vm138_vm5, %v137_v48, 0.0 }
  0xbe   :  { %140 = vadd.xlane.f32.xlu1 %v139_v49 }
  0xc1   :  { %v184_v50 = vpop.eup %183 }
  0xc2   :  { %v101_v52 = vmul.f32 %v184_v50, %v91_v31 }
  0xc4   :  { %v112_v53 = vsub.f32 %v101_v52, %v111_v51 }
  0xc6   :  { %v113_v54 = vand.u32 2147483647, %v112_v53 }
  0xc8   :  { %v115_v55 = vmul.f32 0.5, %v113_v54  ;;  %v176_v57 = vadd.f32 -0.5, %v113_v54  ;;  %vm114_vm7 = vcmp.lt.f32.partialorder %v113_v54, 1.0 }
  0xca   :  { %v116_v56 = vmul.f32 %v115_v55, %v113_v54 }
  0xcc   :  { %v118_v58 = vsel %vm114_vm7, %v116_v56, %v176_v57 }
  0xcd   :  { %v119_v59 = vsel %vm34_vm2, %v118_v58, 0.0 }
  0xce   :  { %120 = vadd.xlane.f32.xlu0 %v119_v59 }
  0xe4   :  { %152 = vrot.lane.b32.xlu0 %v151_v2, %s208_s5 }
 0x147   :  { %v141_v13 = vpop.xlane.xlu1 %140 }
 0x148   :  { %v143_v15 = vmul.f32 0.5, %v141_v13 }
 0x157   :  { %v121_v3 = vpop.xlane.xlu0 %120 }
 0x158   :  { %v122_v4 = vsel %vm54_vm1, %v121_v3, 0.0 }
 0x159   :  { %v123_v6 = vrot.slane %v122_v4, 4 }
 0x15b   :  { %v124_v7 = vadd.f32 %v123_v6, %v122_v4  ;;  %v153_v5 = vpop.permute.xlu0 %152 }
 0x15d   :  { %v125_v8 = vrot.slane %v124_v7, 2 }
 0x15f   :  { %v126_v10 = vadd.f32 %v125_v8, %v124_v7 }
 0x161   :  { %v127_v11 = vrot.slane %v126_v10, 1 }
 0x163   :  { %v128_v12 = vadd.f32 %v127_v11, %v126_v10 }
 0x165   :  { %v129_v14 = vmul.f32 0.125, %v128_v12 }
 0x167   :  { %v144_v16 = vadd.f32 %v129_v14, %v110_v1 }
 0x169   :  { %v145_v17 = vadd.f32 %v144_v16, %v143_v15 }
 0x16b   :  { %146 = vst.msk [vmem:[#allocation5] sm:$0x1] %vm36_vm3, %v145_v17 }
 0x16c   :  { %156 = vst.msk [vmem:[#allocation5] sm:$0x1] %vm155_vm8, %v153_v5 }
 0x16d   :  { %158 = vst.msk [vmem:[#allocation5] sm:$0x1] %vm157_vm9, %v129_v14 }
 0x16e   :  { %160 = vst.msk [vmem:[#allocation5] sm:$0x1] %vm159_vm10, %v143_v15 }
 0x16f   :  { %196 = shalt.err (!%p193_p4)
}
 0x170   :  { %170 = dma.vmem_to_hbm [thread:$0]  %s168_s15, 16, %s310_s8, [#allocation6]  }
 0x171   :  { %205 = dma.done.wait [#allocation6], 16  }
 0x172   :  { %206 = vsyncadd [#allocation6], 4294967280 }
 0x173   :  { %174 = vsyncpa [#allocation6], 1 }

</bundles_post_ra>
